<compile_context>
chip_gen: v7x
topology: tpu7x:2x2x1
jax: 0.10.0
libtpu: 0.0.40
codegen_flags: <defaults>
</compile_context>

<pallas_src>
import functools

import jax
import jax.numpy as jnp
from jax.experimental import pallas as pl
from jax.experimental.pallas import tpu as pltpu

_MIB = 1 << 20
# Conservative double-buffered VMEM footprint budget that fits every generation
# once vmem_limit_bytes is raised explicitly (v7x: 64 MiB physical).
_VMEM_BUDGET = 24 * _MIB


def _round_up(x, m):
    return ((x + m - 1) // m) * m


def _cdiv(a, b):
    return (a + b - 1) // b


def _pick_tm(M, max_tm):
    """Row-tile size: multiple of 128 (or full M when small).

    Prefers (a) >= 2 tiles, (b) an even tile count so the 'parallel' i axis
    load-balances across the two v7x TensorCores, (c) minimal overhang (wasted
    MXU work on rows >= M), then (d) the largest tile.
    """
    max_tm = max(128, (int(max_tm) // 128) * 128)
    if M <= min(256, max_tm):
        return M  # single block == full dim (always a legal block shape)
    best_key, best_tm = None, 128
    for tm in range(128, max_tm + 1, 128):
        nt = _cdiv(M, tm)
        overhang = nt * tm - M
        key = (nt >= 2, nt % 2 == 0, -overhang, tm)
        if best_key is None or key > best_key:
            best_key, best_tm = key, tm
    return best_tm


def _vmem_limit(footprint):
    return int(min(48 * _MIB, max(32 * _MIB, footprint + 4 * _MIB)))


# --------------------------------------------------------------------------- #
# Kernels
# --------------------------------------------------------------------------- #
def _dense_kcollapsed_kernel(adj_ref, emb_ref, out_ref):
    # Whole K in one shot: embeds block is grid-invariant (DMA'd once), adj row
    # tile streamed once, no accumulator logic.
    out_ref[...] = jnp.dot(
        adj_ref[...], emb_ref[...], preferred_element_type=jnp.float32
    ).astype(out_ref.dtype)


def _dense_ktiled_kernel(adj_ref, emb_ref, out_ref, acc_ref, *, K, tk):
    k = pl.program_id(2)

    @pl.when(k == 0)
    def _():
        acc_ref[...] = jnp.zeros_like(acc_ref)

    a = adj_ref[...]
    b = emb_ref[...]
    if K % tk != 0:
        # Mask the K overhang in-register (garbage in the edge block) instead
        # of materializing padded copies of adj/embeds in HBM.
        base = k * tk
        col = jax.lax.broadcasted_iota(jnp.int32, a.shape, 1) + base
        a = jnp.where(col < K, a, 0)
        row = jax.lax.broadcasted_iota(jnp.int32, b.shape, 0) + base
        b = jnp.where(row < K, b, 0)
    acc_ref[...] += jnp.dot(a, b, preferred_element_type=jnp.float32)

    @pl.when(k == pl.num_programs(2) - 1)
    def _():
        out_ref[...] = acc_ref[...].astype(out_ref.dtype)


def _block_sparse_kernel(kidx_ref, cnt_ref, adj_ref, emb_ref, out_ref, acc_ref,
                         *, K, tk):
    i = pl.program_id(0)
    k = pl.program_id(1)

    @pl.when(k == 0)
    def _():
        acc_ref[...] = jnp.zeros_like(acc_ref)

    # Padding steps (k >= count) repeat the previous block index in the
    # index_maps (no DMA) and are skipped here (no matmul).
    @pl.when(k < cnt_ref[i])
    def _():
        a = adj_ref[...]
        b = emb_ref[...]
        if K % tk != 0:
            base = kidx_ref[i, k] * tk
            col = jax.lax.broadcasted_iota(jnp.int32, a.shape, 1) + base
            a = jnp.where(col < K, a, 0)
            row = jax.lax.broadcasted_iota(jnp.int32, b.shape, 0) + base
            b = jnp.where(row < K, b, 0)
        acc_ref[...] += jnp.dot(a, b, preferred_element_type=jnp.float32)

    @pl.when(k == pl.num_programs(1) - 1)
    def _():
        out_ref[...] = acc_ref[...].astype(out_ref.dtype)


# --------------------------------------------------------------------------- #
# Block-sparse metadata (one-time, amortized across GCN layers / train steps)
# --------------------------------------------------------------------------- #
def gcn_block_sparse_meta(adj, *, tm=128, tk=128):
    """Per-row-tile nonzero K-block indices + counts for the block-sparse path.

    Returns (tm, tk, kidx[gi, kmax] int32, counts[gi] int32).  Padding entries
    of kidx repeat the last valid block index so the Pallas pipeline skips
    their DMA.  Must run outside jit (kmax becomes the static k-grid extent).
    tm must be a multiple of 8 (or >= M); tk is rounded to a multiple of 128.
    """
    M, K = adj.shape
    tm = int(min(tm, M))
    tk = int(min(_round_up(tk, 128), _round_up(K, 128)))
    gi, gk = _cdiv(M, tm), _cdiv(K, tk)
    padded = jnp.zeros((gi * tm, gk * tk), adj.dtype).at[:M, :K].set(adj)
    mask = (padded.reshape(gi, tm, gk, tk) != 0).any(axis=(1, 3))        # (gi, gk)
    counts = mask.sum(axis=1).astype(jnp.int32)                          # (gi,)
    order = jnp.argsort((~mask).astype(jnp.int32), axis=1).astype(jnp.int32)
    kmax = max(int(jnp.max(counts)), 1)
    idx = order[:, :kmax]
    last = jnp.take_along_axis(idx, jnp.maximum(counts - 1, 0)[:, None], axis=1)
    pos = jnp.arange(kmax, dtype=jnp.int32)[None, :]
    kidx = jnp.where(pos < counts[:, None], idx, last)
    return tm, tk, kidx, counts


# --------------------------------------------------------------------------- #
# Wrapper
# --------------------------------------------------------------------------- #
def gcn_layer_sp(adj, embeds, *, block_meta=None, tm=None, tk=None):
    """Forward of GCNLayer_sp (dense path): adj @ embeds.

    adj: [M, K], embeds: [K, D].  Store adj in the dtype you want read from
    HBM (e.g. bfloat16, cast once outside) -- the kernel promotes in-register.
    block_meta (from gcn_block_sparse_meta) enables skipping all-zero
    adjacency K-blocks via scalar-prefetched, data-dependent index maps.
    """
    M, K = adj.shape
    K2, D = embeds.shape
    assert K == K2, "adj columns must match embeds rows"
    out_dtype = jnp.result_type(adj.dtype, embeds.dtype)
    adj_is = jnp.dtype(adj.dtype).itemsize
    emb_is = jnp.dtype(embeds.dtype).itemsize
    out_is = jnp.dtype(out_dtype).itemsize
    out_shape = jax.ShapeDtypeStruct((M, D), out_dtype)

    # ---------------- block-sparse path ------------------------------------ #
    if block_meta is not None:
        btm, btk, kidx, counts = block_meta
        gi = _cdiv(M, btm)
        kmax = kidx.shape[1]
        assert kidx.shape[0] == gi and counts.shape == (gi,)
        footprint = (2 * btm * btk * adj_is + 2 * btk * D * emb_is
                     + 2 * btm * D * out_is + btm * D * 4)
        kernel = functools.partial(_block_sparse_kernel, K=K, tk=btk)
        return pl.pallas_call(
            kernel,
            out_shape=out_shape,
            grid_spec=pltpu.PrefetchScalarGridSpec(
                num_scalar_prefetch=2,
                grid=(gi, kmax),
                in_specs=[
                    pl.BlockSpec((btm, btk),
                                 lambda i, k, kidx_r, cnt_r: (i, kidx_r[i, k])),
                    pl.BlockSpec((btk, D),
                                 lambda i, k, kidx_r, cnt_r: (kidx_r[i, k], 0)),
                ],
                out_specs=pl.BlockSpec((btm, D),
                                       lambda i, k, kidx_r, cnt_r: (i, 0)),
                scratch_shapes=[pltpu.VMEM((btm, D), jnp.float32)],
            ),
            compiler_params=pltpu.CompilerParams(
                dimension_semantics=("parallel", "arbitrary"),
                vmem_limit_bytes=_vmem_limit(footprint),
            ),
        )(kidx, counts, adj, embeds)

    # ---------------- dense, K collapsed (adj & embeds each read once) ------ #
    force_ktiled = tk is not None and tk < _round_up(K, 128)
    emb_resident = 2 * K * D * emb_is
    use_collapsed = False
    if not force_ktiled and emb_resident <= _VMEM_BUDGET // 2:
        denom = 2 * (K * adj_is + D * out_is)
        max_tm = max(0, (_VMEM_BUDGET - emb_resident) // denom)
        tm_a = min(tm, M) if tm is not None else _pick_tm(M, max(128, max_tm))
        fp_a = 2 * tm_a * K * adj_is + emb_resident + 2 * tm_a * D * out_is
        use_collapsed = (tm_a == M or tm_a % 8 == 0) and fp_a <= _VMEM_BUDGET
    if use_collapsed:
        gi = _cdiv(M, tm_a)
        return pl.pallas_call(
            _dense_kcollapsed_kernel,
            out_shape=out_shape,
            grid_spec=pltpu.PrefetchScalarGridSpec(
                num_scalar_prefetch=0,
                grid=(gi,),
                in_specs=[
                    pl.BlockSpec((tm_a, K), lambda i: (i, 0)),
                    pl.BlockSpec((K, D), lambda i: (0, 0)),   # grid-invariant
                ],
                out_specs=pl.BlockSpec((tm_a, D), lambda i: (i, 0)),
            ),
            compiler_params=pltpu.CompilerParams(
                dimension_semantics=("parallel",),
                vmem_limit_bytes=_vmem_limit(fp_a),
            ),
        )(adj, embeds)

    # ---------------- dense, K tiled fallback ------------------------------- #
    if tm is None:
        tm_b = _pick_tm(M, 512)
    else:
        tm_b = min(tm, M)
        if tm_b != M:
            tm_b = max(8, (tm_b // 8) * 8)
    # Keep the feature axis collapsed (adj streamed once) unless D is huge.
    tn = D if D <= 2048 else 2048  # TODO(synk): j>1 re-streams adj for huge D.

    def _fp_b(tk_):
        return (2 * tm_b * tk_ * adj_is + 2 * tk_ * tn * emb_is
                + 2 * tm_b * tn * out_is + tm_b * tn * 4)

    if tk is None:
        tk_b = 128  # grow tk preferentially: cheapest VMEM way to cut k steps
        while tk_b * 2 <= min(2048, _round_up(K, 128)) and _fp_b(tk_b * 2) <= _VMEM_BUDGET:
            tk_b *= 2
    else:
        tk_b = max(128, _round_up(tk, 128))
    tk_b = min(tk_b, _round_up(K, 128))

    gi, gj, gk = _cdiv(M, tm_b), _cdiv(D, tn), _cdiv(K, tk_b)
    kernel = functools.partial(_dense_ktiled_kernel, K=K, tk=tk_b)
    return pl.pallas_call(
        kernel,
        out_shape=out_shape,
        grid_spec=pltpu.PrefetchScalarGridSpec(
            num_scalar_prefetch=0,
            grid=(gi, gj, gk),
            in_specs=[
                pl.BlockSpec((tm_b, tk_b), lambda i, j, k: (i, k)),
                pl.BlockSpec((tk_b, tn), lambda i, j, k: (k, j)),
            ],
            out_specs=pl.BlockSpec((tm_b, tn), lambda i, j, k: (i, j)),
            scratch_shapes=[pltpu.VMEM((tm_b, tn), jnp.float32)],
        ),
        compiler_params=pltpu.CompilerParams(
            dimension_semantics=("parallel", "parallel", "arbitrary"),
            vmem_limit_bytes=_vmem_limit(_fp_b(tk_b)),
        ),
    )(adj, embeds)


# --------------------------------------------------------------------------- #
# Demo / self-test
# --------------------------------------------------------------------------- #
if __name__ == "__main__":
    key = jax.random.PRNGKey(0)
    k1, k2, k3, k4 = jax.random.split(key, 4)

    # 1) Dense path, non-128-multiple shapes (K-collapsed kernel, no padding).
    M, N, D = 300, 300, 96
    raw = jax.random.uniform(k1, (M, N), dtype=jnp.float32)
    adj = jnp.where(raw > 0.9, raw, 0.0)                              # ~10% nnz
    adj = adj / jnp.maximum(adj.sum(axis=1, keepdims=True), 1e-6)     # row-norm
    embeds = jax.random.normal(k2, (N, D), dtype=jnp.float32)
    ref = adj @ embeds

    out = jax.block_until_ready(gcn_layer_sp(adj, embeds))
    assert out.shape == (M, D) and out.dtype == jnp.float32
    assert jnp.allclose(out, ref, atol=1e-4, rtol=1e-4)

    # 2) bf16-stored adjacency (caller casts once; kernel reads bf16, acc f32).
    adj_bf16 = adj.astype(jnp.bfloat16)
    out_bf = jax.block_until_ready(gcn_layer_sp(adj_bf16, embeds))
    assert out_bf.dtype == jnp.float32
    assert jnp.allclose(out_bf, ref, atol=5e-2, rtol=5e-2)

    # 3) Forced K-tiled fallback (exercises in-kernel K-overhang masking).
    out_kt = jax.block_until_ready(gcn_layer_sp(adj, embeds, tk=128))
    assert jnp.allclose(out_kt, ref, atol=1e-4, rtol=1e-4)

    # 4) Block-sparse path on a block-banded adjacency (skips zero K-blocks).
    Ms = Ns = 512
    Ds = 128
    bi = jnp.arange(Ms)[:, None] // 128
    bk = jnp.arange(Ns)[None, :] // 128
    band = jnp.abs(bi - bk) <= 1
    vals = jax.random.uniform(k3, (Ms, Ns), dtype=jnp.float32)
    adj_sp = jnp.where(band & (vals > 0.5), vals, 0.0)
    adj_sp = adj_sp / jnp.maximum(adj_sp.sum(axis=1, keepdims=True), 1e-6)
    emb_sp = jax.random.normal(k4, (Ns, Ds), dtype=jnp.float32)
    ref_sp = adj_sp @ emb_sp

    meta = gcn_block_sparse_meta(adj_sp, tm=128, tk=128)  # amortized once
    out_sp = jax.block_until_ready(gcn_layer_sp(adj_sp, emb_sp, block_meta=meta))
    assert out_sp.shape == (Ms, Ds)
    assert jnp.allclose(out_sp, ref_sp, atol=1e-4, rtol=1e-4)

    # 5) bf16 in / bf16 out (f32 accumulation in-kernel).
    out_b = jax.block_until_ready(
        gcn_layer_sp(adj.astype(jnp.bfloat16), embeds.astype(jnp.bfloat16))
    )
    assert out_b.dtype == jnp.bfloat16
    assert jnp.allclose(out_b.astype(jnp.float32), ref, atol=5e-2, rtol=5e-2)

    print("KERNEL_OK")
</pallas_src>

<mosaic_0001>
module attributes {stable_mosaic.version = 11 : i64} {
  func.func @_dense_kcollapsed_kernel(%arg0: i32, %arg1: memref<256x300xf32, #tpu.memory_space<vmem>>, %arg2: memref<300x96xf32, #tpu.memory_space<vmem>>, %arg3: memref<256x96xf32, #tpu.memory_space<vmem>>) attributes {dimension_semantics = [#tpu.dimension_semantics<parallel>], iteration_bounds = array<i64: 2>, scalar_prefetch = 0 : i64, scratch_operands = 0 : i64, tpu.core_type = #tpu.core_type<tc>, window_params = [{transform_indices = @transform_0, window_bounds = array<i64: 256, 300>}, {pipeline_mode = #tpu.pipeline_mode<synchronous>, transform_indices = @transform_1, window_bounds = array<i64: 300, 96>}, {transform_indices = @transform_2, window_bounds = array<i64: 256, 96>}]} {
    %c0 = arith.constant 0 : index
    %c0_0 = arith.constant 0 : index
    %0 = vector.load %arg1[%c0, %c0_0] : memref<256x300xf32, #tpu.memory_space<vmem>>, vector<256x300xf32>
    %c0_1 = arith.constant 0 : index
    %c0_2 = arith.constant 0 : index
    %1 = vector.load %arg2[%c0_1, %c0_2] : memref<300x96xf32, #tpu.memory_space<vmem>>, vector<300x96xf32>
    %cst = arith.constant dense<0.000000e+00> : vector<256x96xf32>
    %2 = tpu.matmul %0, %1, %cst {dimension_numbers = #tpu.dot_dimension_numbers<[1], [0], [0], [1], [0, 0, 1, 1], [], []>} : vector<256x300xf32>, vector<300x96xf32>, vector<256x96xf32> -> vector<256x96xf32>
    %c0_3 = arith.constant 0 : index
    %c0_4 = arith.constant 0 : index
    %3 = vector.load %arg3[%c0_3, %c0_4] : memref<256x96xf32, #tpu.memory_space<vmem>>, vector<256x96xf32>
    tpu.vector_store %arg3[%c0_3, %c0_4], %2 {strides = array<i32>} : memref<256x96xf32, #tpu.memory_space<vmem>>, vector<256x96xf32>,
    return
  }
  func.func @transform_0(%arg0: i32) -> (i32, i32) {
    %c0_i32 = arith.constant 0 : i32
    %c0_i32_0 = arith.constant 0 : i32
    return %arg0, %c0_i32 : i32, i32
  }
  func.func @transform_1(%arg0: i32) -> (i32, i32) {
    %c0_i32 = arith.constant 0 : i32
    %c0_i32_0 = arith.constant 0 : i32
    %c0_i32_1 = arith.constant 0 : i32
    return %c0_i32, %c0_i32_0 : i32, i32
  }
  func.func @transform_2(%arg0: i32) -> (i32, i32) {
    %c0_i32 = arith.constant 0 : i32
    %c0_i32_0 = arith.constant 0 : i32
    return %arg0, %c0_i32 : i32, i32
  }
}

</mosaic_0001>

<bundles_post_ra>
// kernel: tpu_custom_call.1
= control target key start
LH: loop header
LB: loop body
LE: loop exit
PB: predicated region body
PF: predicated region fallthrough
CT: control target
= control target key end

     0   :  { %7 = vsyncpa [#allocation3], 0  ;;  %s2369_s0 = inlined_call_operand.hbm [shape: f32[300,300], index: 0, kind: input, shape index: {}]   ;;  %s2370_s1 = inlined_call_operand.vmem [shape: f32[300,96], index: 1, kind: input, shape index: {}]   ;;  %s2371_s2 = inlined_call_operand.vmem [shape: f32[300,96], index: 2, kind: output, shape index: {}]  }
   0x1   :  { %9 = vsyncpa [#allocation3 + $0x1], 0  ;;  %s1754_s9 = smov 0   ;;  %s1756_s10 = smov 0  }
   0x2   :  { %s1758_s11 = smov 0   ;;  %s1760_s12 = smov 0  }
   0x3 LB: > { %s1773_s13 = sadd.s32 4294967295, %s1700_s12   ;;  %s1776_s14 = sadd.s32 1, %s1700_s12   ;;  %s1700_s12 = sphi %s1760_s12, %s2384_s12   ;;  %s1696_s11 = sphi %s1758_s11, %s2383_s11   ;;  %s1692_s10 = sphi %s1756_s10, %s2382_s10   ;;  %s1688_s9 = sphi %s1754_s9, %s2381_s9  }
   0x4   : > { %s19_s15 = ssub.s32 %s1700_s12, %s1776_s14  ;;  %s22_s16 = sadd.s32 1, %s1696_s11 }
   0x5   : > { %p20_p0 = scmp.eq.s32.totalorder %s19_s15, 0  ;;  %p29_p1 = scmp.ne.s32.totalorder %s1696_s11, %s1692_s10 }
   0x6   : > { %p30_p2 = scmp.eq.s32.totalorder %s1700_s12, 0  ;;  %p35_p3 = scmp.ne.s32.totalorder %s1692_s10, %s1688_s9 }
   0x7   : > { %s1786_s17 = scalar_select %p20_p0, %s1696_s11, %s22_s16  }
   0x8   : > { %p31_p4 = por %p30_p2, %p29_p1  ;;  %p36_p5 = scmp.eq.s32.totalorder %s1773_s13, 0 }
   0x9   : > { %p80_p6 = scmp.eq.s32.totalorder %s1773_s13, 1  ;;  %p1247_p9 = scmp.ge.s32.totalorder %s1700_s12, 2 }
   0xa   : > { %p1790_p7 = por %p36_p5, %p35_p3 }
   0xb   : > { %p1794_p8 = por %p80_p6, %p29_p1  ;;  %105 = sbr.rel (%p1247_p9) target bundleno = 54 (0x36), region = 20 }
  0x12   : > { %108 = sbr.rel (!%p31_p4) target bundleno = 54 (0x36), region = 24  ;;  %s109_s20 = sand.u32 (%p31_p4), 1, %s1696_s11  }
  0x13   : > { %s1248_s21 = sshll.u32 (%p31_p4), %s1700_s12, 5  ;;  %s1502_s22 = smul.u32 (%p31_p4), 768, %s109_s20 }
  0x14   : > { %s115_s23 = ssub.s32 (%p31_p4), 38, %s1248_s21  ;;  %s1804_s26 = scalar_lea.sflag (%p31_p4), [#allocation3], %s109_s20 }
  0x15   : > { %p116_p10 = scmp.lt.s32.totalorder (%p31_p4), %s115_s23, 32  ;;  %s113_s27 = scalar_lea.vmem (%p31_p4), [#allocation2], %s1502_s22 }
  0x19   : > { %s2386_s23 = smov (!%p116_p10, %s115_s23), 32 }
  0x1a   : > { %s1801_s24 = smul.u32 384, %s2386_s23 }
  0x1c   : > { %s121_s25 = ssub.s32 12288, %s1801_s24 }
  0x1d   : > { %122 = vsyncadd %s1804_s26, %s121_s25  ;;  %p1251_p11 = scmp.ne.s32.totalorder %s1801_s24, 0  ;;  %s1503_s28 = smul.u32 12288, %s1700_s12 }
  0x1e   : > { %s128_s29 = sshll.u32 %s113_s27, 4  ;;  %s1610_s8 = scalar_lea.hbm %s2369_s0, 14592  ;;  %s1814_s29 = int_to_ptr.vmem [resolvable:$true] %s128_s29 }
  0x1f   : > { %s1812_s4 = scalar_lea.hbm %s2369_s0, %s1503_s28 }
  0x20   : > { %s1606_s5 = scalar_lea.hbm %s1812_s4, %s1801_s24  ;;  %p1611_p1 = scmp.lt.u32.totalorder %s1812_s4, %s2369_s0 }
  0x21   : > { %p1607_p12 = scmp.ne.s32.totalorder %s1812_s4, %s1606_s5  ;;  %p1612_p2 = scmp.lt.u32.totalorder %s1610_s8, %s1606_s5 }
  0x22   : > { %p1614_p4 = scmp.lt.u32.totalorder %s1606_s5, %s1812_s4 }
  0x23   : > { %p1608_p13 = pnand %p1607_p12, %p1251_p11  ;;  %p1613_p3 = por %p1612_p2, %p1611_p1 }
  0x25   : > { %p1609_p0 = pneg %p1608_p13  ;;  %p1615_p5 = por %p1614_p4, %p1613_p3 }
  0x27   : > { %p1616_p6 = pnand %p1615_p5, %p1609_p0 }
  0x29   : > { %1619 = shalt.err (!%p1616_p6)
}
  0x2a   : > { %s1620_s16 = scalar_lea.vmem %s1814_s29, %s1801_s24  ;;  %s1734_s20 = smov [#allocation2]  }
  0x2b   : > { %p1621_p9 = scmp.ne.s32.totalorder %s1814_s29, %s1620_s16  ;;  %s1624_s21 = sshll.u32 %s1734_s20, 4  ;;  %s1625_s21 = int_to_ptr.vmem [resolvable:$false] %s1624_s21 }
  0x2c   : > { %s1626_s22 = scalar_lea.vmem %s1625_s21, 24576  ;;  %p1627_p13 = scmp.lt.s32.totalorder %s1814_s29, %s1625_s21 }
  0x2d   : > { %p1622_p10 = pnand %p1621_p9, %p1251_p11  ;;  %p1628_p1 = scmp.lt.s32.totalorder %s1626_s22, %s1620_s16 }
  0x2f   : > { %p1623_p12 = pneg %p1622_p10  ;;  %p1629_p2 = por %p1628_p1, %p1627_p13 }
  0x31   : > { %p1630_p3 = pnand %p1629_p2, %p1623_p12 }
  0x33   : > { %1633 = shalt.err (!%p1630_p3)
}
  0x34   : > { %s1735_s23 = smov 384   ;;  %s1736_s25 = smov 24  }
  0x35   : > { %134 = dma.hbm_to_vmem [thread:$0]  (%p1251_p11), %s1812_s4, %s1801_s24, %s1814_s29, %s1804_s26, %s1735_s23, %s1735_s23, %s1736_s25  }
  0x36 PF: > { %p1255_p0 = scmp.ge.s32.totalorder %s1700_s12, 1  ;;  %p136_p4 = scmp.lt.s32.totalorder %s1700_s12, 3 }
  0x38   : > { %p137_p5 = pnand %p1255_p0, %p136_p4 }
  0x39   : > { %s1844_s27 = sand.u32 (!%p137_p5), 1, %s1692_s10  }
  0x3a   : > { %140 = sbr.rel (%p137_p5) target bundleno = 496 (0x1f0), region = 28  ;;  %s143_s30 = scalar_lea.sflag (!%p137_p5), [#allocation3], %s1844_s27 }
  0x3b   : > { %s1504_s28 = smul.u32 (!%p137_p5), 768, %s1844_s27 }
  0x3d   : > { %s1848_s3 = scalar_lea.vmem (!%p137_p5), [#allocation2], %s1504_s28 }
  0x41   : > { %1683 = dma.done.wait (%p1790_p7), %s143_s30, 12288  }
  0x42   : > { %1685 = vsyncadd (%p1790_p7), %s143_s30, 4294955008  ;;  %v1737_v0 = vmov 0.0|0.0   ;;  %v273_v1 = vld [vmem:[%s2370_s1] sm:$0xff]  ;;  %v274_v2 = vld [vmem:[%s2370_s1 + $0x8] sm:$0xff]  ;;  %vm408_vm0 = vcmask 1043456   ;;  %vm1738_vm1 = vmmov 1  }
  0x43   : > { %1408 = vmatprep.subr.bf16.mxu0 %v1737_v0  ;;  %1470 = vmatprep.subr.bf16.mxu1 %v1737_v0  ;;  %v275_v3 = vld [vmem:[%s2370_s1 + $0x10] sm:$0xff]  ;;  %v1409_v4 = vpack.c.bf16 %v274_v2, %v273_v1  ;;  %v276_v5 = vld [vmem:[%s2370_s1 + $0x18] sm:$0xff]  ;;  %v277_v7 = vld [vmem:[%s2370_s1 + $0x20] sm:$0xff]  ;;  %vm311_vm3 = vcmask 359424   ;;  %vm862_vm4 = vcmask 785408   ;;  %s1307_s25 = sshll.u32 (%p1794_p8), %s1773_s13, 8 }
  0x44   : > { %v1412_v6 = vpack.c.bf16 %v276_v5, %v275_v3  ;;  %v278_v8 = vld [vmem:[%s2370_s1 + $0x28] sm:$0xff]  ;;  %v279_v10 = vld [vmem:[%s2370_s1 + $0x30] sm:$0xff]  ;;  %v280_v11 = vld [vmem:[%s2370_s1 + $0x38] sm:$0xff]  ;;  %s2234_s24 = scalar_lea.vmem (%p1794_p8), %s2371_s2, %s1307_s25  }
  0x45   : > { %1410 = vmatpush1.bf16.msra.mxu0 %v1409_v4  ;;  %1486 = vmatpush1.bf16.msra.mxu1 %v1409_v4  ;;  %v1415_v9 = vpack.c.bf16 %v278_v8, %v277_v7  ;;  %v178_v12 = vld [vmem:[%s1848_s3 + $0x8] sm:$0xff]  ;;  %v1418_v13 = vpack.c.bf16 %v280_v11, %v279_v10  ;;  %v281_v15 = vld [vmem:[%s2370_s1 + $0x40] sm:$0xff]  ;;  %v283_v18 = vld [vmem:[%s2370_s1 + $0x50] sm:$0xff] }
  0x46   : > { %1411 = vmatprep.subr.bf16.mxu0 %v1737_v0  ;;  %1471 = vmatprep.subr.bf16.mxu1 %v1737_v0  ;;  %v250_v14 = vld [vmem:[%s1848_s3 + $0x248] sm:$0xff]  ;;  %v284_v19 = vld [vmem:[%s2370_s1 + $0x58] sm:$0xff]  ;;  %v285_v21 = vld [vmem:[%s2370_s1 + $0x60] sm:$0xff] }
  0x47   : > { %v282_v16 = vld [vmem:[%s2370_s1 + $0x48] sm:$0xff]  ;;  %476 = vmatprep.mubr.f32.mxu0 %v178_v12  ;;  %596 = vmatprep.mubr.f32.mxu1 %v250_v14  ;;  %v1424_v20 = vpack.c.bf16 %v284_v19, %v283_v18  ;;  %v287_v24 = vld [vmem:[%s2370_s1 + $0x70] sm:$0xff]  ;;  %v288_v25 = vld [vmem:[%s2370_s1 + $0x78] sm:$0xff] }
  0x48   : > { %v1421_v17 = vpack.c.bf16 %v282_v16, %v281_v15  ;;  %v286_v22 = vld [vmem:[%s2370_s1 + $0x68] sm:$0xff]  ;;  %v1430_v26 = vpack.c.bf16 %v288_v25, %v287_v24  ;;  %v289_v27 = vld [vmem:[%s2370_s1 + $0x80] sm:$0xff]  ;;  %v291_v30 = vld [vmem:[%s2370_s1 + $0x90] sm:$0xff] }
  0x49   : > { %1413 = vmatpush1.bf16.msra.mxu0 %v1412_v6  ;;  %1487 = vmatpush1.bf16.msra.mxu1 %v1412_v6  ;;  %v1427_v23 = vpack.c.bf16 %v286_v22, %v285_v21  ;;  %v290_v28 = vld [vmem:[%s2370_s1 + $0x88] sm:$0xff]  ;;  %v292_v31 = vld [vmem:[%s2370_s1 + $0x98] sm:$0xff]  ;;  %v293_v33 = vld [vmem:[%s2370_s1 + $0xa0] sm:$0xff] }
  0x4a   : > { %1414 = vmatprep.subr.bf16.mxu0 %v1737_v0  ;;  %1472 = vmatprep.subr.bf16.mxu1 %v1737_v0  ;;  %v1433_v29 = vpack.c.bf16 %v290_v28, %v289_v27  ;;  %v1436_v32 = vpack.c.bf16 %v292_v31, %v291_v30  ;;  %v294_v34 = vld [vmem:[%s2370_s1 + $0xa8] sm:$0xff]  ;;  %v295_v36 = vld [vmem:[%s2370_s1 + $0xb0] sm:$0xff]  ;;  %v296_v37 = vld [vmem:[%s2370_s1 + $0xb8] sm:$0xff] }
  0x4b   : > { %v1439_v35 = vpack.c.bf16 %v294_v34, %v293_v33  ;;  %v1442_v38 = vpack.c.bf16 %v296_v37, %v295_v36  ;;  %v297_v39 = vld [vmem:[%s2370_s1 + $0xc0] sm:$0xff]  ;;  %v298_v40 = vld [vmem:[%s2370_s1 + $0xc8] sm:$0xff]  ;;  %v299_v42 = vld [vmem:[%s2370_s1 + $0xd0] sm:$0xff] }
  0x4c   : > { %v1445_v41 = vpack.c.bf16 %v298_v40, %v297_v39  ;;  %v300_v43 = vld [vmem:[%s2370_s1 + $0xd8] sm:$0xff]  ;;  %v301_v45 = vld [vmem:[%s2370_s1 + $0xe0] sm:$0xff]  ;;  %v302_v46 = vld [vmem:[%s2370_s1 + $0xe8] sm:$0xff] }
  0x4d   : > { %1416 = vmatpush1.bf16.msra.mxu0 %v1415_v9  ;;  %1488 = vmatpush1.bf16.msra.mxu1 %v1415_v9  ;;  %v1448_v44 = vpack.c.bf16 %v300_v43, %v299_v42  ;;  %v1451_v47 = vpack.c.bf16 %v302_v46, %v301_v45  ;;  %v303_v48 = vld [vmem:[%s2370_s1 + $0xf0] sm:$0xff]  ;;  %v304_v49 = vld [vmem:[%s2370_s1 + $0xf8] sm:$0xff]  ;;  %v305_v50 = vld [vmem:[%s2370_s1 + $0x100] sm:$0xff] }
  0x4e   : > { %1417 = vmatprep.subr.bf16.mxu0 %v1737_v0  ;;  %1473 = vmatprep.subr.bf16.mxu1 %v1737_v0  ;;  %v306_v51 = vld [vmem:[%s2370_s1 + $0x108] sm:$0xff]  ;;  %v1454_v52 = vpack.c.bf16 %v304_v49, %v303_v48  ;;  %v307_v54 = vld [vmem:[%s2370_s1 + $0x110] sm:$0xff]  ;;  %v308_v55 = vld [vmem:[%s2370_s1 + $0x118] sm:$0xff] }
  0x4f   : > { %v1456_v53 = vpack.c.bf16 %v306_v51, %v305_v50  ;;  %v177_v56 = vld [vmem:[%s1848_s3] sm:$0xff]  ;;  %v1460_v59 = vpack.c.bf16 %v308_v55, %v307_v54  ;;  %v310_v62 = vld [vmem:[%s2370_s1 + $0x128] sm:$0xf]  ;;  %v180_v63 = vld [vmem:[%s1848_s3 + $0x18] sm:$0xff] }
  0x50   : > { %v249_v57 = vld [vmem:[%s1848_s3 + $0x240] sm:$0xff]  ;;  %v184_v1 = vld [vmem:[%s1848_s3 + $0x38] sm:$0xff]  ;;  %vm2010_vm2 = vmpackc.low %vm408_vm0, %vm1738_vm1 }
  0x51   : > { %1419 = vmatpush1.bf16.msra.mxu0 %v1418_v13  ;;  %1489 = vmatpush1.bf16.msra.mxu1 %v1418_v13  ;;  %v181_v58 = vld [vmem:[%s1848_s3 + $0x20] sm:$0xff]  ;;  %v256_v2 = vld [vmem:[%s1848_s3 + $0x278] sm:$0xff]  ;;  %v183_v5 = vld [vmem:[%s1848_s3 + $0x30] sm:$0xff] }
  0x52   : > { %1420 = vmatprep.subr.bf16.mxu0 %v1737_v0  ;;  %1474 = vmatprep.subr.bf16.mxu1 %v1737_v0  ;;  %v253_v60 = vld [vmem:[%s1848_s3 + $0x260] sm:$0xff]  ;;  %v255_v6 = vld [vmem:[%s1848_s3 + $0x270] sm:$0xff]  ;;  %v186_v9 = vld [vmem:[%s1848_s3 + $0x48] sm:$0xff] }
  0x53   : > { %v309_v61 = vld [vmem:[%s2370_s1 + $0x120] sm:$0xff]  ;;  %v187_v7 = vld [vmem:[%s1848_s3 + $0x50] sm:$0xff]  ;;  %v258_v10 = vld [vmem:[%s1848_s3 + $0x288] sm:$0xff] }
  0x54   : > { %v1464_v3 = vpack.c.bf16 %v310_v62, %v309_v61  ;;  %v259_v8 = vld [vmem:[%s1848_s3 + $0x290] sm:$0xff]  ;;  %v190_v11 = vld [vmem:[%s1848_s3 + $0x68] sm:$0xff]  ;;  %v189_v13 = vld [vmem:[%s1848_s3 + $0x60] sm:$0xff] }
  0x55   : > { %1422 = vmatpush1.bf16.msra.mxu0 %v1421_v17  ;;  %1490 = vmatpush1.bf16.msra.mxu1 %v1421_v17  ;;  %v262_v12 = vld [vmem:[%s1848_s3 + $0x2a8] sm:$0xff]  ;;  %v261_v14 = vld [vmem:[%s1848_s3 + $0x2a0] sm:$0xff]  ;;  %v192_v17 = vld [vmem:[%s1848_s3 + $0x78] sm:$0xff] }
  0x56   : > { %1423 = vmatprep.subr.bf16.mxu0 %v1737_v0  ;;  %1475 = vmatprep.subr.bf16.mxu1 %v1737_v0  ;;  %v193_v15 = vld [vmem:[%s1848_s3 + $0x80] sm:$0xff]  ;;  %v264_v18 = vld [vmem:[%s1848_s3 + $0x2b8] sm:$0xff]  ;;  %v195_v21 = vld [vmem:[%s1848_s3 + $0x90] sm:$0xff] }
  0x57   : > { %v265_v16 = vld [vmem:[%s1848_s3 + $0x2c0] sm:$0xff]  ;;  %v196_v19 = vld [vmem:[%s1848_s3 + $0x98] sm:$0xff]  ;;  %v267_v22 = vld [vmem:[%s1848_s3 + $0x2d0] sm:$0xff] }
  0x58   : > { %v271_v24 = vld [vmem:[%s1848_s3 + $0x2f0] sm:$0xff]  ;;  %v198_v25 = vld [vmem:[%s1848_s3 + $0xa8] sm:$0xff]  ;;  %v205_v31 = vld [vmem:[%s1848_s3 + $0xe0] sm:$0xff] }
  0x59   : > { %1425 = vmatpush1.bf16.msra.mxu0 %v1424_v20  ;;  %1491 = vmatpush1.bf16.msra.mxu1 %v1424_v20  ;;  %v268_v20 = vld [vmem:[%s1848_s3 + $0x2d8] sm:$0xff]  ;;  %v202_v27 = vld [vmem:[%s1848_s3 + $0xc8] sm:$0xff]  ;;  %v179_v28 = vld [vmem:[%s1848_s3 + $0x10] sm:$0xff] }
  0x5a   : > { %1426 = vmatprep.subr.bf16.mxu0 %v1737_v0  ;;  %1476 = vmatprep.subr.bf16.mxu1 %v1737_v0  ;;  %v182_v30 = vld [vmem:[%s1848_s3 + $0x28] sm:$0xff]  ;;  %v204_v33 = vld [vmem:[%s1848_s3 + $0xd8] sm:$0xff]  ;;  %v191_v36 = vld [vmem:[%s1848_s3 + $0x70] sm:$0xff] }
  0x5b   : > { %v188_v34 = vld [vmem:[%s1848_s3 + $0x58] sm:$0xff]  ;;  %v207_v37 = vld [vmem:[%s1848_s3 + $0xf0] sm:$0xff]  ;;  %v197_v40 = vld [vmem:[%s1848_s3 + $0xa0] sm:$0xff] }
  0x5c   : > { %v211_v39 = vld [vmem:[%s1848_s3 + $0x110] sm:$0xff]  ;;  %v200_v42 = vld [vmem:[%s1848_s3 + $0xb8] sm:$0xff]  ;;  %v214_v43 = vld [vmem:[%s1848_s3 + $0x128] sm:$0xff] }
  0x5d   : > { %1428 = vmatpush1.bf16.msra.mxu0 %v1427_v23  ;;  %1492 = vmatpush1.bf16.msra.mxu1 %v1427_v23  ;;  %v199_v23 = vld [vmem:[%s1848_s3 + $0xb0] sm:$0xff]  ;;  %v213_v45 = vld [vmem:[%s1848_s3 + $0x120] sm:$0xff]  ;;  %v206_v46 = vld [vmem:[%s1848_s3 + $0xe8] sm:$0xff] }
  0x5e   : > { %1429 = vmatprep.subr.bf16.mxu0 %v1737_v0  ;;  %1477 = vmatprep.subr.bf16.mxu1 %v1737_v0  ;;  %v209_v48 = vld [vmem:[%s1848_s3 + $0x100] sm:$0xff]  ;;  %v216_v49 = vld [vmem:[%s1848_s3 + $0x138] sm:$0xff]  ;;  %v218_v54 = vld [vmem:[%s1848_s3 + $0x148] sm:$0xff] }
  0x5f   : > { %v212_v50 = vld [vmem:[%s1848_s3 + $0x118] sm:$0xff]  ;;  %v223_v55 = vld [vmem:[%s1848_s3 + $0x170] sm:$0xff]  ;;  %v225_v61 = vld [vmem:[%s1848_s3 + $0x180] sm:$0xff] }
  0x60   : > { %v220_v51 = vld [vmem:[%s1848_s3 + $0x158] sm:$0xff]  ;;  %v230_v62 = vld [vmem:[%s1848_s3 + $0x1a8] sm:$0xff]  ;;  %v239_v4 = vld [vmem:[%s1848_s3 + $0x1f0] sm:$0xff] }
  0x61   : > { %1431 = vmatpush1.bf16.msra.mxu0 %v1430_v26  ;;  %1493 = vmatpush1.bf16.msra.mxu1 %v1430_v26  ;;  %v270_v26 = vld [vmem:[%s1848_s3 + $0x2e8] sm:$0xff] }
  0x62   : > { %1432 = vmatprep.subr.bf16.mxu0 %v1737_v0  ;;  %1478 = vmatprep.subr.bf16.mxu1 %v1737_v0 }
  0x65   : > { %1434 = vmatpush1.bf16.msra.mxu0 %v1433_v29  ;;  %1494 = vmatpush1.bf16.msra.mxu1 %v1433_v29  ;;  %v201_v29 = vld [vmem:[%s1848_s3 + $0xc0] sm:$0xff] }
  0x66   : > { %1435 = vmatprep.subr.bf16.mxu0 %v1737_v0  ;;  %1479 = vmatprep.subr.bf16.mxu1 %v1737_v0 }
  0x69   : > { %1437 = vmatpush1.bf16.msra.mxu0 %v1436_v32  ;;  %1495 = vmatpush1.bf16.msra.mxu1 %v1436_v32  ;;  %v185_v32 = vld [vmem:[%s1848_s3 + $0x40] sm:$0xff] }
  0x6a   : > { %1438 = vmatprep.subr.bf16.mxu0 %v1737_v0  ;;  %1480 = vmatprep.subr.bf16.mxu1 %v1737_v0 }
  0x6d   : > { %1440 = vmatpush1.bf16.msra.mxu0 %v1439_v35  ;;  %1496 = vmatpush1.bf16.msra.mxu1 %v1439_v35  ;;  %v208_v35 = vld [vmem:[%s1848_s3 + $0xf8] sm:$0xff] }
  0x6e   : > { %1441 = vmatprep.subr.bf16.mxu0 %v1737_v0  ;;  %1481 = vmatprep.subr.bf16.mxu1 %v1737_v0 }
  0x71   : > { %1443 = vmatpush1.bf16.msra.mxu0 %v1442_v38  ;;  %1497 = vmatpush1.bf16.msra.mxu1 %v1442_v38  ;;  %v194_v38 = vld [vmem:[%s1848_s3 + $0x88] sm:$0xff] }
  0x72   : > { %1444 = vmatprep.subr.bf16.mxu0 %v1737_v0  ;;  %1482 = vmatprep.subr.bf16.mxu1 %v1737_v0 }
  0x75   : > { %1446 = vmatpush1.bf16.msra.mxu0 %v1445_v41  ;;  %1498 = vmatpush1.bf16.msra.mxu1 %v1445_v41  ;;  %v210_v41 = vld [vmem:[%s1848_s3 + $0x108] sm:$0xff] }
  0x76   : > { %1447 = vmatprep.subr.bf16.mxu0 %v1737_v0  ;;  %1483 = vmatprep.subr.bf16.mxu1 %v1737_v0 }
  0x79   : > { %1449 = vmatpush1.bf16.msra.mxu0 %v1448_v44  ;;  %1499 = vmatpush1.bf16.msra.mxu1 %v1448_v44  ;;  %v203_v44 = vld [vmem:[%s1848_s3 + $0xd0] sm:$0xff] }
  0x7a   : > { %1450 = vmatprep.subr.bf16.mxu0 %v1737_v0  ;;  %1484 = vmatprep.subr.bf16.mxu1 %v1737_v0 }
  0x7d   : > { %1452 = vmatpush1.bf16.msra.mxu0 %v1451_v47  ;;  %1500 = vmatpush1.bf16.msra.mxu1 %v1451_v47  ;;  %v217_v47 = vld [vmem:[%s1848_s3 + $0x140] sm:$0xff] }
  0x7e   : > { %1453 = vmatprep.subr.bf16.mxu0 %v1737_v0  ;;  %1485 = vmatprep.subr.bf16.mxu1 %v1737_v0  ;;  %v252_v0 = vld [vmem:[%s1848_s3 + $0x258] sm:$0xff] }
  0x81   : > { %1455 = vmatpush1.bf16.msra.mxu0 %v1454_v52  ;;  %1501 = vmatpush1.bf16.msra.mxu1 %v1454_v52  ;;  %v215_v52 = vld [vmem:[%s1848_s3 + $0x130] sm:$0xff] }
  0x82   : > { %1457 = vmatprep.subr.bf16.mxu1 %v1456_v53 }
  0x84   : > { %477 = vmatmul.mubr.f32.vlgmr.msra.gmra.mrb[0].mxu0 %v177_v56  ;;  %597 = vmatmul.mubr.f32.vlgmr.msra.gmra.mrb[0].mxu1 %v249_v57  ;;  %v221_v56 = vld [vmem:[%s1848_s3 + $0x160] sm:$0xff]  ;;  %v222_v57 = vld [vmem:[%s1848_s3 + $0x168] sm:$0xff] }
  0x85   : > { %1459 = vmatpush3.bf16.msra.mxu1 %v1456_v53  ;;  %481 = vmatprep.mubr.f32.mxu0 %v181_v58  ;;  %v219_v53 = vld [vmem:[%s1848_s3 + $0x150] sm:$0xff]  ;;  %v224_v58 = vld [vmem:[%s1848_s3 + $0x178] sm:$0xff] }
  0x86   : > { %601 = vmatprep.mubr.f32.mxu1 %v253_v60  ;;  %1461 = vmatprep.subr.bf16.mxu1 %v1460_v59  ;;  %v227_v60 = vld [vmem:[%s1848_s3 + $0x190] sm:$0xff] }
  0x88   : > { %482 = vmatmul.mubr.f32.gmra.mrb[2].mxu0 %v180_v63  ;;  %602 = vmatmul.mubr.f32.gmra.mrb[2].mxu1 %v252_v0  ;;  %v229_v63 = vld [vmem:[%s1848_s3 + $0x1a0] sm:$0xff] }
  0x89   : > { %486 = vmatprep.mubr.f32.mxu0 %v184_v1  ;;  %606 = vmatprep.mubr.f32.mxu1 %v256_v2  ;;  %v233_v0 = vld [vmem:[%s1848_s3 + $0x1c0] sm:$0xff]  ;;  %v228_v1 = vld [vmem:[%s1848_s3 + $0x198] sm:$0xff] }
  0x8a   : > { %1463 = vmatpush3.bf16.msra.mxu1 %v1460_v59  ;;  %v226_v59 = vld [vmem:[%s1848_s3 + $0x188] sm:$0xff]  ;;  %v236_v2 = vld [vmem:[%s1848_s3 + $0x1d8] sm:$0xff] }
  0x8b   : > { %1466 = vmatprep.subr.msk.bf16.mxu1 %vm2010_vm2, %v1464_v3 }
  0x8c   : > { %487 = vmatmul.mubr.f32.gmra.mrb[4].mxu0 %v183_v5  ;;  %607 = vmatmul.mubr.f32.gmra.mrb[4].mxu1 %v255_v6  ;;  %v231_v5 = vld [vmem:[%s1848_s3 + $0x1b0] sm:$0xff]  ;;  %v242_v6 = vld [vmem:[%s1848_s3 + $0x208] sm:$0xff] }
  0x8d   : > { %491 = vmatprep.mubr.f32.mxu0 %v187_v7  ;;  %611 = vmatprep.mubr.f32.mxu1 %v259_v8  ;;  %v235_v7 = vld [vmem:[%s1848_s3 + $0x1d0] sm:$0xff]  ;;  %v245_v8 = vld [vmem:[%s1848_s3 + $0x220] sm:$0xff] }
  0x8e   : > { %1469 = vmatpush3.bf16.msk.msra.mxu1 %vm2010_vm2, %v1464_v3  ;;  %v232_v3 = vld [vmem:[%s1848_s3 + $0x1b8] sm:$0xff] }
  0x90   : > { %492 = vmatmul.mubr.f32.gmra.mrb[6].mxu0 %v186_v9  ;;  %612 = vmatmul.mubr.f32.gmra.mrb[6].mxu1 %v258_v10  ;;  %v234_v9 = vld [vmem:[%s1848_s3 + $0x1c8] sm:$0xff]  ;;  %v248_v10 = vld [vmem:[%s1848_s3 + $0x238] sm:$0xff] }
  0x91   : > { %496 = vmatprep.mubr.f32.mxu0 %v190_v11  ;;  %616 = vmatprep.mubr.f32.mxu1 %v262_v12  ;;  %v238_v11 = vld [vmem:[%s1848_s3 + $0x1e8] sm:$0xff]  ;;  %v251_v12 = vld [vmem:[%s1848_s3 + $0x250] sm:$0xff] }
  0x94   : > { %497 = vmatmul.mubr.f32.gmra.mrb[8].mxu0 %v189_v13  ;;  %617 = vmatmul.mubr.f32.gmra.mrb[8].mxu1 %v261_v14  ;;  %v237_v13 = vld [vmem:[%s1848_s3 + $0x1e0] sm:$0xff]  ;;  %v254_v14 = vld [vmem:[%s1848_s3 + $0x268] sm:$0xff] }
  0x95   : > { %501 = vmatprep.mubr.f32.mxu0 %v193_v15  ;;  %621 = vmatprep.mubr.f32.mxu1 %v265_v16  ;;  %v241_v15 = vld [vmem:[%s1848_s3 + $0x200] sm:$0xff] }
  0x96   : > { %v257_v16 = vld [vmem:[%s1848_s3 + $0x280] sm:$0xff] }
  0x98   : > { %502 = vmatmul.mubr.f32.gmra.mrb[10].mxu0 %v192_v17  ;;  %622 = vmatmul.mubr.f32.gmra.mrb[10].mxu1 %v264_v18  ;;  %v240_v17 = vld [vmem:[%s1848_s3 + $0x1f8] sm:$0xff] }
  0x99   : > { %506 = vmatprep.mubr.f32.mxu0 %v196_v19  ;;  %626 = vmatprep.mubr.f32.mxu1 %v268_v20  ;;  %v260_v18 = vld [vmem:[%s1848_s3 + $0x298] sm:$0xff]  ;;  %v263_v20 = vld [vmem:[%s1848_s3 + $0x2b0] sm:$0xff] }
  0x9a   : > { %v244_v19 = vld [vmem:[%s1848_s3 + $0x218] sm:$0xff] }
  0x9c   : > { %507 = vmatmul.mubr.f32.gmra.mrb[12].mxu0 %v195_v21  ;;  %627 = vmatmul.mubr.f32.gmra.mrb[12].mxu1 %v267_v22  ;;  %v243_v21 = vld [vmem:[%s1848_s3 + $0x210] sm:$0xff]  ;;  %v266_v22 = vld [vmem:[%s1848_s3 + $0x2c8] sm:$0xff] }
  0x9d   : > { %511 = vmatprep.mubr.f32.mxu0 %v199_v23  ;;  %631 = vmatprep.mubr.f32.mxu1 %v271_v24  ;;  %v247_v23 = vld [vmem:[%s1848_s3 + $0x230] sm:$0xff]  ;;  %v269_v24 = vld [vmem:[%s1848_s3 + $0x2e0] sm:$0xff] }
  0xa0   : > { %512 = vmatmul.mubr.f32.gmra.mrb[14].mxu0 %v198_v25  ;;  %632 = vmatmul.mubr.f32.gmra.mrb[14].mxu1 %v270_v26  ;;  %v246_v25 = vld [vmem:[%s1848_s3 + $0x228] sm:$0xff]  ;;  %v272_v26 = vld [vmem:[%s1848_s3 + $0x2f8] sm:$0xff]  ;;  %s1256_s3 = sshll.u32 %s1844_s27, 8  ;;  %s1291_s27 = sshll.u32 (%p1794_p8), %s1773_s13, 5 }
  0xa1   : > { %516 = vmatprep.mubr.f32.mxu0 %v202_v27  ;;  %1360 = vmatprep.mubr.msk.f32.mxu1 %vm311_vm3, %v179_v28  ;;  %s2153_s23 = scalar_lea.vmem [#allocation4], %s1256_s3   ;;  %s903_s28 = ssub.s32 (%p1794_p8), 38, %s1291_s27 }
  0xa2   : > { %p904_p7 = scmp.lt.s32.totalorder (%p1794_p8), %s903_s28, 32 }
  0xa4   : > { %517 = vmatmul.mubr.f32.gmra.mrb[16].mxu0 %v201_v29  ;;  %1361 = vmatmul.mubr.msk.f32.vlgmr.msra.gmra.mrb[16].mxu1 %vm311_vm3, %v182_v30 }
  0xa5   : > { %521 = vmatprep.mubr.f32.mxu0 %v205_v31  ;;  %1363 = vmatprep.mubr.msk.f32.mxu1 %vm311_vm3, %v185_v32 }
  0xa8   : > { %522 = vmatmul.mubr.f32.gmra.mrb[18].mxu0 %v204_v33  ;;  %1364 = vmatmul.mubr.msk.f32.gmra.mrb[18].mxu1 %vm311_vm3, %v188_v34 }
  0xa9   : > { %526 = vmatprep.mubr.f32.mxu0 %v208_v35  ;;  %1366 = vmatprep.mubr.msk.f32.mxu1 %vm311_vm3, %v191_v36 }
  0xac   : > { %527 = vmatmul.mubr.f32.gmra.mrb[20].mxu0 %v207_v37  ;;  %1367 = vmatmul.mubr.msk.f32.gmra.mrb[20].mxu1 %vm311_vm3, %v194_v38 }
  0xad   : > { %531 = vmatprep.mubr.f32.mxu0 %v211_v39  ;;  %1369 = vmatprep.mubr.msk.f32.mxu1 %vm311_vm3, %v197_v40 }
  0xb0   : > { %532 = vmatmul.mubr.f32.gmra.mrb[22].mxu0 %v210_v41  ;;  %1370 = vmatmul.mubr.msk.f32.gmra.mrb[22].mxu1 %vm311_vm3, %v200_v42 }
  0xb1   : > { %536 = vmatprep.mubr.f32.mxu0 %v214_v43  ;;  %1372 = vmatprep.mubr.msk.f32.mxu1 %vm311_vm3, %v203_v44 }
  0xb4   : > { %537 = vmatmul.mubr.f32.gmra.mrb[24].mxu0 %v213_v45  ;;  %1373 = vmatmul.mubr.msk.f32.gmra.mrb[24].mxu1 %vm311_vm3, %v206_v46 }
  0xb5   : > { %541 = vmatprep.mubr.f32.mxu0 %v217_v47  ;;  %1375 = vmatprep.mubr.msk.f32.mxu1 %vm311_vm3, %v209_v48 }
  0xb8   : > { %542 = vmatmul.mubr.f32.gmra.mrb[26].mxu0 %v216_v49  ;;  %1376 = vmatmul.mubr.msk.f32.gmra.mrb[26].mxu1 %vm311_vm3, %v212_v50 }
  0xb9   : > { %546 = vmatprep.mubr.f32.mxu0 %v220_v51  ;;  %1378 = vmatprep.mubr.msk.f32.mxu1 %vm311_vm3, %v215_v52 }
  0xbc   : > { %547 = vmatmul.mubr.f32.gmra.mrb[28].mxu0 %v219_v53  ;;  %1379 = vmatmul.mubr.msk.f32.gmra.mrb[28].mxu1 %vm311_vm3, %v218_v54 }
  0xbd   : > { %551 = vmatprep.mubr.f32.mxu0 %v223_v55  ;;  %1381 = vmatprep.mubr.msk.f32.mxu1 %vm311_vm3, %v221_v56 }
  0xc0   : > { %552 = vmatmul.mubr.f32.gmra.mrb[30].mxu0 %v222_v57  ;;  %1382 = vmatmul.mubr.msk.f32.gmra.mrb[30].mxu1 %vm311_vm3, %v224_v58 }
  0xc1   : > { %556 = vmatprep.mubr.f32.mxu0 %v226_v59  ;;  %1384 = vmatprep.mubr.msk.f32.mxu1 %vm311_vm3, %v227_v60 }
  0xc4   : > { %557 = vmatmul.mubr.f32.gmra.mrb[32].mxu0 %v225_v61  ;;  %1385 = vmatmul.mubr.msk.f32.gmra.mrb[32].mxu1 %vm311_vm3, %v230_v62 }
  0xc5   : > { %561 = vmatprep.mubr.f32.mxu0 %v229_v63  ;;  %1387 = vmatprep.mubr.msk.f32.mxu1 %vm311_vm3, %v233_v0 }
  0xc8   : > { %562 = vmatmul.mubr.f32.gmra.mrb[34].mxu0 %v228_v1  ;;  %1388 = vmatmul.mubr.msk.f32.gmra.mrb[34].mxu1 %vm311_vm3, %v236_v2 }
  0xc9   : > { %566 = vmatprep.mubr.f32.mxu0 %v232_v3  ;;  %1390 = vmatprep.mubr.msk.f32.mxu1 %vm311_vm3, %v239_v4 }
  0xcc   : > { %567 = vmatmul.mubr.f32.gmra.mrb[36].mxu0 %v231_v5  ;;  %1391 = vmatmul.mubr.msk.f32.gmra.mrb[36].mxu1 %vm311_vm3, %v242_v6 }
  0xcd   : > { %571 = vmatprep.mubr.f32.mxu0 %v235_v7  ;;  %1393 = vmatprep.mubr.msk.f32.mxu1 %vm311_vm3, %v245_v8 }
  0xd0   : > { %572 = vmatmul.mubr.f32.gmra.mrb[38].mxu0 %v234_v9  ;;  %1394 = vmatmul.mubr.msk.f32.gmra.mrb[38].mxu1 %vm311_vm3, %v248_v10 }
  0xd1   : > { %576 = vmatprep.mubr.f32.mxu0 %v238_v11  ;;  %1396 = vmatprep.mubr.msk.f32.mxu1 %vm311_vm3, %v251_v12 }
  0xd4   : > { %577 = vmatmul.mubr.f32.gmra.mrb[40].mxu0 %v237_v13  ;;  %1397 = vmatmul.mubr.msk.f32.gmra.mrb[40].mxu1 %vm311_vm3, %v254_v14 }
  0xd5   : > { %581 = vmatprep.mubr.f32.mxu0 %v241_v15  ;;  %1399 = vmatprep.mubr.msk.f32.mxu1 %vm311_vm3, %v257_v16 }
  0xd8   : > { %582 = vmatmul.mubr.f32.gmra.mrb[42].mxu0 %v240_v17  ;;  %1400 = vmatmul.mubr.msk.f32.gmra.mrb[42].mxu1 %vm311_vm3, %v260_v18 }
  0xd9   : > { %586 = vmatprep.mubr.f32.mxu0 %v244_v19  ;;  %1402 = vmatprep.mubr.msk.f32.mxu1 %vm311_vm3, %v263_v20 }
  0xdc   : > { %587 = vmatmul.mubr.f32.gmra.mrb[44].mxu0 %v243_v21  ;;  %1403 = vmatmul.mubr.msk.f32.gmra.mrb[44].mxu1 %vm311_vm3, %v266_v22 }
  0xdd   : > { %591 = vmatprep.mubr.f32.mxu0 %v247_v23  ;;  %1405 = vmatprep.mubr.msk.f32.mxu1 %vm311_vm3, %v269_v24 }
  0xe0   : > { %592 = vmatmul.mubr.f32.gmra.mrb[46].mxu0 %v246_v25  ;;  %1406 = vmatmul.mubr.msk.f32.gmra.mrb[46].mxu1 %vm311_vm3, %v272_v26 }
 0x157   : > { %v2136_v27 = vpop.f32.mrb[0].mxu1  ;;  %v478_v28 = vpop.f32.mrb[0].mxu0 }
 0x158   : > { %v600_v29 = vpop.f32.mrb[1].mxu1  ;;  %v480_v30 = vpop.f32.mrb[1].mxu0 }
 0x15b   : > { %v2138_v31 = vpop.f32.mrb[2].mxu1  ;;  %v483_v32 = vpop.f32.mrb[2].mxu0 }
 0x15c   : > { %v605_v33 = vpop.f32.mrb[3].mxu1  ;;  %v485_v34 = vpop.f32.mrb[3].mxu0 }
 0x15f   : > { %v2140_v35 = vpop.f32.mrb[4].mxu1  ;;  %v488_v36 = vpop.f32.mrb[4].mxu0 }
 0x160   : > { %v610_v37 = vpop.f32.mrb[5].mxu1  ;;  %v490_v38 = vpop.f32.mrb[5].mxu0 }
 0x163   : > { %v2142_v39 = vpop.f32.mrb[6].mxu1  ;;  %v493_v40 = vpop.f32.mrb[6].mxu0 }
 0x164   : > { %v615_v41 = vpop.f32.mrb[7].mxu1  ;;  %v495_v42 = vpop.f32.mrb[7].mxu0 }
 0x167   : > { %v2144_v43 = vpop.f32.mrb[8].mxu1  ;;  %v498_v44 = vpop.f32.mrb[8].mxu0 }
 0x168   : > { %v620_v45 = vpop.f32.mrb[9].mxu1  ;;  %v500_v46 = vpop.f32.mrb[9].mxu0 }
 0x16b   : > { %v2146_v47 = vpop.f32.mrb[10].mxu1  ;;  %v503_v48 = vpop.f32.mrb[10].mxu0 }
 0x16c   : > { %v625_v49 = vpop.f32.mrb[11].mxu1  ;;  %v505_v50 = vpop.f32.mrb[11].mxu0 }
 0x16f   : > { %v2148_v51 = vpop.f32.mrb[12].mxu1  ;;  %v508_v52 = vpop.f32.mrb[12].mxu0 }
 0x170   : > { %v630_v53 = vpop.f32.mrb[13].mxu1  ;;  %v510_v54 = vpop.f32.mrb[13].mxu0 }
 0x173   : > { %v2150_v55 = vpop.f32.mrb[14].mxu1  ;;  %v513_v56 = vpop.f32.mrb[14].mxu0 }
 0x174   : > { %v635_v57 = vpop.f32.mrb[15].mxu1  ;;  %v515_v58 = vpop.f32.mrb[15].mxu0 }
 0x177   : > { %v1362_v59 = vpop.f32.mrb[16].mxu1  ;;  %v518_v60 = vpop.f32.mrb[16].mxu0 }
 0x178   : > { %v709_v61 = vadd.f32 %v1362_v59, %v483_v32  ;;  %v703_v62 = vpop.f32.mrb[17].mxu1  ;;  %v520_v63 = vpop.f32.mrb[17].mxu0 }
 0x179   : > { %v704_v0 = vadd.f32 %v703_v62, %v478_v28 }
 0x17a   : > { %864 = vst.msk [vmem:[%s2153_s23 + $0x8] sm:$0xff] %vm862_vm4, %v709_v61 }
 0x17b   : > { %863 = vst.msk [vmem:[%s2153_s23] sm:$0xff] %vm862_vm4, %v704_v0  ;;  %v1365_v1 = vpop.f32.mrb[18].mxu1  ;;  %v523_v2 = vpop.f32.mrb[18].mxu0 }
 0x17c   : > { %v719_v3 = vadd.f32 %v1365_v1, %v493_v40  ;;  %v713_v4 = vpop.f32.mrb[19].mxu1  ;;  %v525_v5 = vpop.f32.mrb[19].mxu0 }
 0x17d   : > { %v714_v6 = vadd.f32 %v713_v4, %v488_v36 }
 0x17e   : > { %866 = vst.msk [vmem:[%s2153_s23 + $0x18] sm:$0xff] %vm862_vm4, %v719_v3 }
 0x17f   : > { %865 = vst.msk [vmem:[%s2153_s23 + $0x10] sm:$0xff] %vm862_vm4, %v714_v6  ;;  %v1368_v7 = vpop.f32.mrb[20].mxu1  ;;  %v528_v8 = vpop.f32.mrb[20].mxu0 }
 0x180   : > { %v729_v9 = vadd.f32 %v1368_v7, %v503_v48  ;;  %v723_v10 = vpop.f32.mrb[21].mxu1  ;;  %v530_v11 = vpop.f32.mrb[21].mxu0 }
 0x181   : > { %v724_v12 = vadd.f32 %v723_v10, %v498_v44 }
 0x182   : > { %868 = vst.msk [vmem:[%s2153_s23 + $0x28] sm:$0xff] %vm862_vm4, %v729_v9 }
 0x183   : > { %867 = vst.msk [vmem:[%s2153_s23 + $0x20] sm:$0xff] %vm862_vm4, %v724_v12  ;;  %v1371_v13 = vpop.f32.mrb[22].mxu1  ;;  %v533_v14 = vpop.f32.mrb[22].mxu0 }
 0x184   : > { %v739_v15 = vadd.f32 %v1371_v13, %v513_v56  ;;  %v733_v16 = vpop.f32.mrb[23].mxu1  ;;  %v535_v17 = vpop.f32.mrb[23].mxu0 }
 0x185   : > { %v734_v18 = vadd.f32 %v733_v16, %v508_v52 }
 0x186   : > { %870 = vst.msk [vmem:[%s2153_s23 + $0x38] sm:$0xff] %vm862_vm4, %v739_v15 }
 0x187   : > { %869 = vst.msk [vmem:[%s2153_s23 + $0x30] sm:$0xff] %vm862_vm4, %v734_v18  ;;  %v1374_v19 = vpop.f32.mrb[24].mxu1  ;;  %v538_v20 = vpop.f32.mrb[24].mxu0 }
 0x188   : > { %v749_v21 = vadd.f32 %v1374_v19, %v523_v2  ;;  %v743_v22 = vpop.f32.mrb[25].mxu1  ;;  %v540_v23 = vpop.f32.mrb[25].mxu0 }
 0x189   : > { %v744_v24 = vadd.f32 %v743_v22, %v518_v60 }
 0x18a   : > { %872 = vst.msk [vmem:[%s2153_s23 + $0x48] sm:$0xff] %vm862_vm4, %v749_v21 }
 0x18b   : > { %871 = vst.msk [vmem:[%s2153_s23 + $0x40] sm:$0xff] %vm862_vm4, %v744_v24  ;;  %v1377_v25 = vpop.f32.mrb[26].mxu1  ;;  %v543_v26 = vpop.f32.mrb[26].mxu0 }
 0x18c   : > { %v759_v28 = vadd.f32 %v1377_v25, %v533_v14  ;;  %v753_v29 = vpop.f32.mrb[27].mxu1  ;;  %v545_v30 = vpop.f32.mrb[27].mxu0 }
 0x18d   : > { %v754_v32 = vadd.f32 %v753_v29, %v528_v8 }
 0x18e   : > { %874 = vst.msk [vmem:[%s2153_s23 + $0x58] sm:$0xff] %vm862_vm4, %v759_v28 }
 0x18f   : > { %873 = vst.msk [vmem:[%s2153_s23 + $0x50] sm:$0xff] %vm862_vm4, %v754_v32  ;;  %v1380_v33 = vpop.f32.mrb[28].mxu1  ;;  %v548_v34 = vpop.f32.mrb[28].mxu0 }
 0x190   : > { %v769_v36 = vadd.f32 %v1380_v33, %v543_v26  ;;  %v763_v37 = vpop.f32.mrb[29].mxu1  ;;  %v550_v38 = vpop.f32.mrb[29].mxu0 }
 0x191   : > { %v764_v40 = vadd.f32 %v763_v37, %v538_v20 }
 0x192   : > { %876 = vst.msk [vmem:[%s2153_s23 + $0x68] sm:$0xff] %vm862_vm4, %v769_v36 }
 0x193   : > { %875 = vst.msk [vmem:[%s2153_s23 + $0x60] sm:$0xff] %vm862_vm4, %v764_v40  ;;  %v1383_v41 = vpop.f32.mrb[30].mxu1  ;;  %v553_v42 = vpop.f32.mrb[30].mxu0 }
 0x194   : > { %v779_v44 = vadd.f32 %v1383_v41, %v553_v42  ;;  %v773_v45 = vpop.f32.mrb[31].mxu1  ;;  %v555_v46 = vpop.f32.mrb[31].mxu0 }
 0x195   : > { %v774_v48 = vadd.f32 %v773_v45, %v548_v34 }
 0x196   : > { %878 = vst.msk [vmem:[%s2153_s23 + $0x78] sm:$0xff] %vm862_vm4, %v779_v44 }
 0x197   : > { %877 = vst.msk [vmem:[%s2153_s23 + $0x70] sm:$0xff] %vm862_vm4, %v774_v48  ;;  %v1386_v49 = vpop.f32.mrb[32].mxu1  ;;  %v558_v50 = vpop.f32.mrb[32].mxu0 }
 0x198   : > { %v783_v52 = vpop.f32.mrb[33].mxu1  ;;  %v560_v53 = vpop.f32.mrb[33].mxu0 }
 0x199   : > { %v784_v54 = vadd.f32 %v783_v52, %v558_v50 }
 0x19b   : > { %879 = vst.msk [vmem:[%s2153_s23 + $0x80] sm:$0xff] %vm862_vm4, %v784_v54  ;;  %v563_v56 = vpop.f32.mrb[34].mxu0  ;;  %v1389_v57 = vpop.f32.mrb[34].mxu1 }
 0x19c   : > { %v789_v58 = vadd.f32 %v1386_v49, %v563_v56  ;;  %v793_v59 = vpop.f32.mrb[35].mxu1  ;;  %v565_v60 = vpop.f32.mrb[35].mxu0 }
 0x19e   : > { %880 = vst.msk [vmem:[%s2153_s23 + $0x88] sm:$0xff] %vm862_vm4, %v789_v58 }
 0x19f   : > { %v568_v61 = vpop.f32.mrb[36].mxu0  ;;  %v1392_v62 = vpop.f32.mrb[36].mxu1 }
 0x1a0   : > { %v794_v63 = vadd.f32 %v793_v59, %v568_v61  ;;  %v803_v0 = vpop.f32.mrb[37].mxu1  ;;  %v570_v1 = vpop.f32.mrb[37].mxu0 }
 0x1a2   : > { %881 = vst.msk [vmem:[%s2153_s23 + $0x90] sm:$0xff] %vm862_vm4, %v794_v63 }
 0x1a3   : > { %v573_v2 = vpop.f32.mrb[38].mxu0  ;;  %v1395_v3 = vpop.f32.mrb[38].mxu1 }
 0x1a4   : > { %v799_v4 = vadd.f32 %v1389_v57, %v573_v2  ;;  %v813_v5 = vpop.f32.mrb[39].mxu1  ;;  %v575_v6 = vpop.f32.mrb[39].mxu0 }
 0x1a6   : > { %882 = vst.msk [vmem:[%s2153_s23 + $0x98] sm:$0xff] %vm862_vm4, %v799_v4 }
 0x1a7   : > { %v578_v7 = vpop.f32.mrb[40].mxu0  ;;  %v1398_v8 = vpop.f32.mrb[40].mxu1 }
 0x1a8   : > { %v804_v9 = vadd.f32 %v803_v0, %v578_v7  ;;  %v829_v10 = vadd.f32 %v1398_v8, %v2138_v31  ;;  %v823_v11 = vpop.f32.mrb[41].mxu1  ;;  %v580_v12 = vpop.f32.mrb[41].mxu0 }
 0x1a9   : > { %v824_v13 = vadd.f32 %v823_v11, %v2136_v27 }
 0x1aa   : > { %883 = vst.msk [vmem:[%s2153_s23 + $0xa0] sm:$0xff] %vm862_vm4, %v804_v9  ;;  %888 = vst.msk [vmem:[%s2153_s23 + $0xc8] sm:$0xff] %vm862_vm4, %v829_v10 }
 0x1ab   : > { %887 = vst.msk [vmem:[%s2153_s23 + $0xc0] sm:$0xff] %vm862_vm4, %v824_v13  ;;  %v583_v14 = vpop.f32.mrb[42].mxu0  ;;  %v1401_v15 = vpop.f32.mrb[42].mxu1 }
 0x1ac   : > { %v809_v16 = vadd.f32 %v1392_v62, %v583_v14  ;;  %v839_v17 = vadd.f32 %v1401_v15, %v2142_v39  ;;  %v833_v31 = vpop.f32.mrb[43].mxu1  ;;  %v585_v18 = vpop.f32.mrb[43].mxu0 }
 0x1ad   : > { %v834_v19 = vadd.f32 %v833_v31, %v2140_v35 }
 0x1ae   : > { %884 = vst.msk [vmem:[%s2153_s23 + $0xa8] sm:$0xff] %vm862_vm4, %v809_v16  ;;  %890 = vst.msk [vmem:[%s2153_s23 + $0xd8] sm:$0xff] %vm862_vm4, %v839_v17 }
 0x1af   : > { %889 = vst.msk [vmem:[%s2153_s23 + $0xd0] sm:$0xff] %vm862_vm4, %v834_v19  ;;  %v588_v27 = vpop.f32.mrb[44].mxu0  ;;  %v1404_v20 = vpop.f32.mrb[44].mxu1 }
 0x1b0   : > { %v814_v21 = vadd.f32 %v813_v5, %v588_v27  ;;  %v849_v22 = vadd.f32 %v1404_v20, %v2146_v47  ;;  %v843_v39 = vpop.f32.mrb[45].mxu1  ;;  %v590_v23 = vpop.f32.mrb[45].mxu0 }
 0x1b1   : > { %v844_v24 = vadd.f32 %v843_v39, %v2144_v43  ;;  %901 = sbr.rel (!%p1794_p8) target bundleno = 496 (0x1f0), region = 36 }
 0x1b2   : > { %885 = vst.msk [vmem:[%s2153_s23 + $0xb0] sm:$0xff] %vm862_vm4, %v814_v21  ;;  %892 = vst.msk [vmem:[%s2153_s23 + $0xe8] sm:$0xff] %vm862_vm4, %v849_v22 }
 0x1b3   : > { %891 = vst.msk [vmem:[%s2153_s23 + $0xe0] sm:$0xff] %vm862_vm4, %v844_v24  ;;  %v593_v35 = vpop.f32.mrb[46].mxu0  ;;  %v1407_v25 = vpop.f32.mrb[46].mxu1 }
 0x1b4   : > { %v819_v26 = vadd.f32 %v1395_v3, %v593_v35  ;;  %v859_v28 = vadd.f32 %v1407_v25, %v2150_v55  ;;  %v853_v29 = vpop.f32.mrb[47].mxu1  ;;  %v595_v30 = vpop.f32.mrb[47].mxu0 }
 0x1b5   : > { %v854_v47 = vadd.f32 %v853_v29, %v2148_v51 }
 0x1b6   : > { %886 = vst.msk [vmem:[%s2153_s23 + $0xb8] sm:$0xff] %vm862_vm4, %v819_v26  ;;  %894 = vst.msk [vmem:[%s2153_s23 + $0xf8] sm:$0xff] %vm862_vm4, %v859_v28 }
 0x1b7   : > { %893 = vst.msk [vmem:[%s2153_s23 + $0xf0] sm:$0xff] %vm862_vm4, %v854_v47 }
 0x1b8   : > { %s2388_s28 = smov (!%p904_p7, %s903_s28), 32 }
 0x1b9   : > { %s1292_s26 = sshll.u32 %s2388_s28, 7 }
 0x1ba   : > { %p1295_p11 = scmp.eq.s32.totalorder %s1292_s26, 0 }
 0x1bb   : > { %s2240_s19 = sshrl.u32 (!%p1295_p11), %s2388_s28, 5 }
 0x1bc   : > { %912 = sbr.rel (%p1295_p11) target bundleno = 496 (0x1f0), region = 40  ;;  %p1296_p8 = scmp.le.s32.totalorder (!%p1295_p11), %s2240_s19, 0 }
 0x1c3   : > { %1198 = sbr.rel (%p1296_p8) target bundleno = 475 (0x1db), region = 122  ;;  %s2376_s13 = smov (!%p1296_p8), %s2234_s24 }
 0x1c4   : > { %s2377_s29 = smov (!%p1296_p8), %s2153_s23  ;;  %s2249_s4 = smov (!%p1296_p8), 0  }
 0x1c5   : > { %s2251_s5 = smov (!%p1296_p8), 0  }
 0x1ca LB: >> { %v1036_v43 = vld [vmem:[%s1708_s29] sm:$0xff]  ;;  %v1038_v51 = vld [vmem:[%s1708_s29 + $0x8] sm:$0xff]  ;;  %v1040_v55 = vld [vmem:[%s1708_s29 + $0x10] sm:$0xff]  ;;  %s1100_s18 = sadd.s32 1, %s1712_s4  ;;  %s1030_s5 = sadd.s32 1, %s1716_s5   ;;  %s1716_s5 = sphi %s2251_s5, %s1030_s5   ;;  %s1712_s4 = sphi %s2249_s4, %s2380_s4   ;;  %s1708_s29 = sphi %s2377_s29, %s2379_s29   ;;  %s1704_s13 = sphi %s2376_s13, %s2378_s13  }
 0x1cb   : >> { %1037 = vst [vmem:[%s1704_s13] sm:$0xff] %v1036_v43  ;;  %1039 = vst [vmem:[%s1704_s13 + $0x8] sm:$0xff] %v1038_v51  ;;  %v1042_v32 = vld [vmem:[%s1708_s29 + $0x18] sm:$0xff]  ;;  %v1044_v33 = vld [vmem:[%s1708_s29 + $0x20] sm:$0xff]  ;;  %p1101_p6 = scmp.ge.s32.totalorder %s1100_s18, %s2240_s19  ;;  %p1029_p9 = scmp.ge.s32.totalorder %s1030_s5, %s2240_s19 }
 0x1cc   : >> { %1041 = vst [vmem:[%s1704_s13 + $0x10] sm:$0xff] %v1040_v55  ;;  %v1046_v34 = vld [vmem:[%s1708_s29 + $0x28] sm:$0xff]  ;;  %1043 = vst [vmem:[%s1704_s13 + $0x18] sm:$0xff] %v1042_v32  ;;  %v1048_v36 = vld [vmem:[%s1708_s29 + $0x30] sm:$0xff] }
 0x1cd   : >> { %1045 = vst [vmem:[%s1704_s13 + $0x20] sm:$0xff] %v1044_v33  ;;  %1047 = vst [vmem:[%s1704_s13 + $0x28] sm:$0xff] %v1046_v34  ;;  %v1050_v37 = vld [vmem:[%s1708_s29 + $0x38] sm:$0xff]  ;;  %v1052_v38 = vld [vmem:[%s1708_s29 + $0x40] sm:$0xff]  ;;  %s2390_s18 = smov (%p1101_p6, %s1100_s18), 0 }
 0x1ce   : >> { %1049 = vst [vmem:[%s1704_s13 + $0x30] sm:$0xff] %v1048_v36  ;;  %1051 = vst [vmem:[%s1704_s13 + $0x38] sm:$0xff] %v1050_v37  ;;  %v1054_v40 = vld [vmem:[%s1708_s29 + $0x48] sm:$0xff]  ;;  %v1056_v41 = vld [vmem:[%s1708_s29 + $0x50] sm:$0xff]  ;;  %s1297_s6 = sshll.u32 %s2390_s18, 8  ;;  %s2380_s4 = smov %s2390_s18 }
 0x1cf   : >> { %1053 = vst [vmem:[%s1704_s13 + $0x40] sm:$0xff] %v1052_v38  ;;  %v1058_v42 = vld [vmem:[%s1708_s29 + $0x58] sm:$0xff]  ;;  %1055 = vst [vmem:[%s1704_s13 + $0x48] sm:$0xff] %v1054_v40  ;;  %v1060_v44 = vld [vmem:[%s1708_s29 + $0x60] sm:$0xff]  ;;  %s2307_s7 = scalar_lea.vmem %s2153_s23, %s1297_s6 [#allocation4]   ;;  %s1106_s8 = scalar_lea.vmem %s2234_s24, %s1297_s6  }
 0x1d0   : >> { %1057 = vst [vmem:[%s1704_s13 + $0x50] sm:$0xff] %v1056_v41  ;;  %1059 = vst [vmem:[%s1704_s13 + $0x58] sm:$0xff] %v1058_v42  ;;  %v1062_v45 = vld [vmem:[%s1708_s29 + $0x68] sm:$0xff]  ;;  %v1064_v46 = vld [vmem:[%s1708_s29 + $0x70] sm:$0xff] }
 0x1d1   : >> { %1061 = vst [vmem:[%s1704_s13 + $0x60] sm:$0xff] %v1060_v44  ;;  %1063 = vst [vmem:[%s1704_s13 + $0x68] sm:$0xff] %v1062_v45  ;;  %v1066_v48 = vld [vmem:[%s1708_s29 + $0x78] sm:$0xff]  ;;  %v1068_v49 = vld [vmem:[%s1708_s29 + $0x80] sm:$0xff] }
 0x1d2   : >> { %1065 = vst [vmem:[%s1704_s13 + $0x70] sm:$0xff] %v1064_v46  ;;  %v1070_v50 = vld [vmem:[%s1708_s29 + $0x88] sm:$0xff]  ;;  %1067 = vst [vmem:[%s1704_s13 + $0x78] sm:$0xff] %v1066_v48  ;;  %v1072_v52 = vld [vmem:[%s1708_s29 + $0x90] sm:$0xff] }
 0x1d3   : >> { %1069 = vst [vmem:[%s1704_s13 + $0x80] sm:$0xff] %v1068_v49  ;;  %1071 = vst [vmem:[%s1704_s13 + $0x88] sm:$0xff] %v1070_v50  ;;  %v1074_v53 = vld [vmem:[%s1708_s29 + $0x98] sm:$0xff]  ;;  %v1076_v54 = vld [vmem:[%s1708_s29 + $0xa0] sm:$0xff] }
 0x1d4   : >> { %1073 = vst [vmem:[%s1704_s13 + $0x90] sm:$0xff] %v1072_v52  ;;  %1075 = vst [vmem:[%s1704_s13 + $0x98] sm:$0xff] %v1074_v53  ;;  %v1078_v56 = vld [vmem:[%s1708_s29 + $0xa8] sm:$0xff]  ;;  %v1080_v57 = vld [vmem:[%s1708_s29 + $0xb0] sm:$0xff]  ;;  %1032 = sbr.rel (!%p1029_p9) target bundleno = 458 (0x1ca), region = 128 }
 0x1d5   : >> { %1077 = vst [vmem:[%s1704_s13 + $0xa0] sm:$0xff] %v1076_v54  ;;  %v1082_v58 = vld [vmem:[%s1708_s29 + $0xb8] sm:$0xff]  ;;  %1079 = vst [vmem:[%s1704_s13 + $0xa8] sm:$0xff] %v1078_v56  ;;  %v1084_v59 = vld [vmem:[%s1708_s29 + $0xc0] sm:$0xff] }
 0x1d6   : >> { %1081 = vst [vmem:[%s1704_s13 + $0xb0] sm:$0xff] %v1080_v57  ;;  %1083 = vst [vmem:[%s1704_s13 + $0xb8] sm:$0xff] %v1082_v58  ;;  %v1086_v60 = vld [vmem:[%s1708_s29 + $0xc8] sm:$0xff]  ;;  %v1088_v61 = vld [vmem:[%s1708_s29 + $0xd0] sm:$0xff] }
 0x1d7   : >> { %1085 = vst [vmem:[%s1704_s13 + $0xc0] sm:$0xff] %v1084_v59  ;;  %1087 = vst [vmem:[%s1704_s13 + $0xc8] sm:$0xff] %v1086_v60  ;;  %v1090_v62 = vld [vmem:[%s1708_s29 + $0xd8] sm:$0xff]  ;;  %v1092_v63 = vld [vmem:[%s1708_s29 + $0xe0] sm:$0xff] }
 0x1d8   : >> { %1089 = vst [vmem:[%s1704_s13 + $0xd0] sm:$0xff] %v1088_v61  ;;  %v1094_v0 = vld [vmem:[%s1708_s29 + $0xe8] sm:$0xff]  ;;  %1091 = vst [vmem:[%s1704_s13 + $0xd8] sm:$0xff] %v1090_v62  ;;  %v1096_v1 = vld [vmem:[%s1708_s29 + $0xf0] sm:$0xff] }
 0x1d9   : >> { %1093 = vst [vmem:[%s1704_s13 + $0xe0] sm:$0xff] %v1092_v63  ;;  %1095 = vst [vmem:[%s1704_s13 + $0xe8] sm:$0xff] %v1094_v0  ;;  %v1098_v2 = vld [vmem:[%s1708_s29 + $0xf8] sm:$0xff]  ;;  %s2379_s29 = smov %s2307_s7 }
 0x1da   : >> { %1097 = vst [vmem:[%s1704_s13 + $0xf0] sm:$0xff] %v1096_v1  ;;  %1099 = vst [vmem:[%s1704_s13 + $0xf8] sm:$0xff] %v1098_v2  ;;  %s2378_s13 = smov %s1106_s8 }
 0x1db PF: > { %s2348_s9 = sand.u32 31, %s2388_s28   ;;  %s1308_s15 = sshll.u32 %s2240_s19, 8 }
 0x1dc   : > { %s1111_s16 = scalar_lea.vmem %s2153_s23, %s1308_s15 [#allocation4]   ;;  %s1113_s20 = scalar_lea.vmem %s2234_s24, %s1308_s15  }
 0x1dd   : > { %p1302_p10 = scmp.le.s32.totalorder %s2348_s9, 0 }
 0x1de   : > { %s1718_s21 = smov (!%p1302_p10), %s1113_s20   ;;  %s1722_s22 = smov (!%p1302_p10), %s1111_s16  }
 0x1df   : > { %1212 = sbr.rel (%p1302_p10) target bundleno = 496 (0x1f0), region = 133  ;;  %s1726_s3 = smov (!%p1302_p10), 0  }
 0x1e0   : > { %s1730_s27 = smov (!%p1302_p10), 0  }
 0x1e6 LB: >> { %v1123_v3 = vld [vmem:[%s1724_s22] sm:$0xff]  ;;  %s1125_s25 = sadd.s32 1, %s1728_s3  ;;  %s1117_s27 = sadd.s32 1, %s1732_s27   ;;  %s1732_s27 = sphi %s1730_s27, %s1117_s27   ;;  %s1728_s3 = sphi %s1726_s3, %s1727_s3   ;;  %s1724_s22 = sphi %s1722_s22, %s1130_s22   ;;  %s1720_s21 = sphi %s1718_s21, %s1131_s21  }
 0x1e7   : >> { %1124 = vst [vmem:[%s1720_s21] sm:$0xff] %v1123_v3  ;;  %p1126_p12 = scmp.ge.s32.totalorder %s1125_s25, %s2348_s9  ;;  %p1116_p13 = scmp.ge.s32.totalorder %s1117_s27, %s2348_s9 }
 0x1e9   : >> { %s2392_s25 = smov (%p1126_p12, %s1125_s25), 0  ;;  %1119 = sbr.rel (!%p1116_p13) target bundleno = 486 (0x1e6), region = 139 }
 0x1ea   : >> { %s1303_s23 = sshll.u32 %s2392_s25, 3  ;;  %s1727_s3 = smov %s2392_s25  }
 0x1eb   : >> { %s1130_s22 = scalar_lea.vmem %s1111_s16, %s1303_s23 [#allocation4]   ;;  %s1131_s21 = scalar_lea.vmem %s1113_s20, %s1303_s23  }
 0x1f0 PF: > { %p12_p1 = scmp.ge.s32.totalorder %s1776_s14, 4   ;;  %s2381_s9 = smov %s1692_s10 }
 0x1f1   : > { %s2382_s10 = smov %s1696_s11  ;;  %s2383_s11 = smov %s1786_s17 }
 0x1f2   : > { %s2384_s12 = smov %s1776_s14  ;;  %14 = sbr.rel (!%p12_p1) target bundleno = 3 (0x3), region = 150 }
 0x1f9   :  { %1147 = vsyncpa [#allocation3], 1 }
 0x1fa   :  { %1149 = vsyncpa [#allocation3 + $0x1], 1 }

</bundles_post_ra>
